<compile_context>
chip_gen: v5e
topology: v5e:2x2
jax: 0.10.0
libtpu: 0.0.40
codegen_flags: <defaults>
</compile_context>

<pallas_src>
import jax
import jax.numpy as jnp
from jax.experimental import pallas as pl
from jax.experimental.pallas import tpu as pltpu

NUM_CORES = 2                       # parallel leading axis (v7x megacore); harmless on 1-TC chips
_TARGET_BLOCK_BYTES = 1 << 20       # ~1 MiB per input block


def _masked_sse_kernel(x_ref, t_ref, m_ref, sse_ref, cnt_ref):
    bi = pl.program_id(1)
    li = pl.program_id(2)

    @pl.when(jnp.logical_and(bi == 0, li == 0))
    def _():
        sse_ref[...] = jnp.zeros_like(sse_ref)
        cnt_ref[...] = jnp.zeros_like(cnt_ref)

    x = x_ref[...]                                   # (TB, C, TL) f32
    t = t_ref[...]                                   # (TB, C, TL) f32
    nm = 1.0 - m_ref[...].astype(jnp.float32)        # (TB, 1, TL), 1 where kept

    d = x - t
    d2m = (d * d) * nm                               # implicit broadcast over C
    # Leading-axis reduces only (VALU adds); cross-lane reduce deferred to wrapper.
    sse_ref[...] += jnp.sum(d2m, axis=0, keepdims=True)   # (1, C, TL)
    cnt_ref[...] += jnp.sum(nm, axis=0, keepdims=True)    # (1, 1, TL)


def _plain_sse_kernel(x_ref, t_ref, sse_ref):
    bi = pl.program_id(1)
    li = pl.program_id(2)

    @pl.when(jnp.logical_and(bi == 0, li == 0))
    def _():
        sse_ref[...] = jnp.zeros_like(sse_ref)

    d = x_ref[...] - t_ref[...]
    sse_ref[...] += jnp.sum(d * d, axis=0, keepdims=True)


def _choose_tiles(B, C, L):
    # Lane tile: multiple of 128 dividing the padded L, bounded by the VMEM budget.
    Lp = ((L + 127) // 128) * 128
    TL = 128
    for cand in (2048, 1024, 512, 256, 128):
        if Lp % cand == 0 and C * cand * 4 <= _TARGET_BLOCK_BYTES:
            TL = cand
            break
    NL = Lp // TL
    # Batch tile: fill up to ~1 MiB per input block, at most ceil(B / NUM_CORES).
    tb_cap = -(-B // NUM_CORES)
    TB = max(1, min(_TARGET_BLOCK_BYTES // (C * TL * 4), tb_cap))
    NB = -(-B // (NUM_CORES * TB))
    Bp = NUM_CORES * NB * TB
    return Lp, TL, NL, TB, NB, Bp


def masked_mse_loss(inputs, mask, targets, use_mask=True):
    """inputs, targets: (B, C, L) float; mask: (B, L) bool (True = masked out)."""
    B, C, L = inputs.shape
    Lp, TL, NL, TB, NB, Bp = _choose_tiles(B, C, L)

    x = inputs.astype(jnp.float32)
    t = targets.astype(jnp.float32)
    if (Bp, Lp) != (B, L):
        pad = ((0, Bp - B), (0, 0), (0, Lp - L))
        x = jnp.pad(x, pad)            # zero padding -> diff == 0 there
        t = jnp.pad(t, pad)

    grid = (NUM_CORES, NB, NL)
    dim_sems = ("parallel", "arbitrary", "arbitrary")

    def data_spec():
        return pl.BlockSpec((TB, C, TL), lambda c, b, l: (c * NB + b, 0, l))

    if use_mask:
        m = mask.reshape(B, 1, L).astype(jnp.int8)
        if (Bp, Lp) != (B, L):
            # Pad with 1 (= masked out) so padding contributes nothing to N.
            m = jnp.pad(m, ((0, Bp - B), (0, 0), (0, Lp - L)), constant_values=1)

        sse, cnt = pl.pallas_call(
            _masked_sse_kernel,
            out_shape=(
                jax.ShapeDtypeStruct((NUM_CORES, C, TL), jnp.float32),
                jax.ShapeDtypeStruct((NUM_CORES, 1, TL), jnp.float32),
            ),
            grid_spec=pltpu.PrefetchScalarGridSpec(
                num_scalar_prefetch=0,
                grid=grid,
                in_specs=[
                    data_spec(),
                    data_spec(),
                    pl.BlockSpec((TB, 1, TL), lambda c, b, l: (c * NB + b, 0, l)),
                ],
                out_specs=(
                    pl.BlockSpec((1, C, TL), lambda c, b, l: (c, 0, 0)),
                    pl.BlockSpec((1, 1, TL), lambda c, b, l: (c, 0, 0)),
                ),
            ),
            compiler_params=pltpu.CompilerParams(dimension_semantics=dim_sems),
        )(x, t, m)

        n = C * jnp.sum(cnt)           # not_mask repeated over C in the reference
        return jnp.sum(sse) / n

    # use_mask=False: plain MSE (mean reduction); no mask streamed at all.
    sse = pl.pallas_call(
        _plain_sse_kernel,
        out_shape=jax.ShapeDtypeStruct((NUM_CORES, C, TL), jnp.float32),
        grid_spec=pltpu.PrefetchScalarGridSpec(
            num_scalar_prefetch=0,
            grid=grid,
            in_specs=[data_spec(), data_spec()],
            out_specs=pl.BlockSpec((1, C, TL), lambda c, b, l: (c, 0, 0)),
        ),
        compiler_params=pltpu.CompilerParams(dimension_semantics=dim_sems),
    )(x, t)
    return jnp.sum(sse) / (B * C * L)


def _reference(inputs, mask, targets, use_mask=True):
    if not use_mask:
        return jnp.mean((inputs - targets) ** 2)
    not_mask = (~mask)[:, None, :].astype(jnp.float32)
    not_mask = jnp.broadcast_to(not_mask, inputs.shape)
    n = jnp.sum(not_mask)
    return jnp.sum(((inputs - targets) * not_mask) ** 2) / n


if __name__ == "__main__":
    key = jax.random.PRNGKey(0)
    k1, k2, k3 = jax.random.split(key, 3)

    # Small shapes consistent with the module: (B, C, L) = (2, 4, 16).
    B, C, L = 2, 4, 16
    inputs = jax.random.normal(k1, (B, C, L), dtype=jnp.float32)
    targets = jax.random.normal(k2, (B, C, L), dtype=jnp.float32)
    mask = jax.random.bernoulli(k3, p=0.3, shape=(B, L))   # True = masked out

    loss = jax.block_until_ready(masked_mse_loss(inputs, mask, targets, use_mask=True))
    ref = _reference(inputs, mask, targets, use_mask=True)
    assert jnp.allclose(loss, ref, rtol=1e-5, atol=1e-5), (loss, ref)

    # use_mask=False path (plain MSE, mean reduction) -- no mask streamed.
    loss_nm = jax.block_until_ready(masked_mse_loss(inputs, mask, targets, use_mask=False))
    ref_nm = _reference(inputs, mask, targets, use_mask=False)
    assert jnp.allclose(loss_nm, ref_nm, rtol=1e-5, atol=1e-5), (loss_nm, ref_nm)

    # Second case exercising L-padding (200 -> 256), TB > 1 and batch padding.
    B2, C2, L2 = 5, 8, 200
    k4, k5, k6 = jax.random.split(jax.random.PRNGKey(1), 3)
    x2 = jax.random.normal(k4, (B2, C2, L2), dtype=jnp.float32)
    t2 = jax.random.normal(k5, (B2, C2, L2), dtype=jnp.float32)
    m2 = jax.random.bernoulli(k6, p=0.5, shape=(B2, L2))
    loss2 = jax.block_until_ready(masked_mse_loss(x2, m2, t2, use_mask=True))
    ref2 = _reference(x2, m2, t2, use_mask=True)
    assert jnp.allclose(loss2, ref2, rtol=1e-5, atol=1e-5), (loss2, ref2)

    print("KERNEL_OK")
</pallas_src>

<mosaic_0001>
module attributes {stable_mosaic.version = 11 : i64} {
  func.func @_masked_sse_kernel(%arg0: i32, %arg1: i32, %arg2: i32, %arg3: memref<1x4x128xf32, #tpu.memory_space<vmem>>, %arg4: memref<1x4x128xf32, #tpu.memory_space<vmem>>, %arg5: memref<1x1x128xi8, #tpu.memory_space<vmem>>, %arg6: memref<1x4x128xf32, #tpu.memory_space<vmem>>, %arg7: memref<1x1x128xf32, #tpu.memory_space<vmem>>) attributes {dimension_semantics = [#tpu.dimension_semantics<parallel>, #tpu.dimension_semantics<arbitrary>, #tpu.dimension_semantics<arbitrary>], iteration_bounds = array<i64: 2, 1, 1>, scalar_prefetch = 0 : i64, scratch_operands = 0 : i64, tpu.core_type = #tpu.core_type<tc>, window_params = [{transform_indices = @transform_0, window_bounds = array<i64: 1, 4, 128>}, {transform_indices = @transform_1, window_bounds = array<i64: 1, 4, 128>}, {transform_indices = @transform_2, window_bounds = array<i64: 1, 1, 128>}, {transform_indices = @transform_3, window_bounds = array<i64: 1, 4, 128>}, {transform_indices = @transform_4, window_bounds = array<i64: 1, 1, 128>}]} {
    %c0_i32 = arith.constant 0 : i32
    %0 = arith.cmpi eq, %arg1, %c0_i32 : i32
    %c0_i32_0 = arith.constant 0 : i32
    %1 = arith.cmpi eq, %arg2, %c0_i32_0 : i32
    %2 = arith.andi %0, %1 : i1
    %3 = arith.extui %2 : i1 to i32
    %c0_i32_1 = arith.constant 0 : i32
    %4 = arith.cmpi ne, %3, %c0_i32_1 : i32
    scf.if %4 {
      %cst_24 = arith.constant 0.000000e+00 : f32
      %25 = vector.broadcast %cst_24 : f32 to vector<1x4x128xf32>
      %c0_25 = arith.constant 0 : index
      %c0_26 = arith.constant 0 : index
      %c0_27 = arith.constant 0 : index
      %26 = vector.load %arg6[%c0_25, %c0_26, %c0_27] : memref<1x4x128xf32, #tpu.memory_space<vmem>>, vector<1x4x128xf32>
      tpu.vector_store %arg6[%c0_25, %c0_26, %c0_27], %25 {strides = array<i32>} : memref<1x4x128xf32, #tpu.memory_space<vmem>>, vector<1x4x128xf32>,
      %cst_28 = arith.constant 0.000000e+00 : f32
      %27 = vector.broadcast %cst_28 : f32 to vector<1x1x128xf32>
      %c0_29 = arith.constant 0 : index
      %c0_30 = arith.constant 0 : index
      %c0_31 = arith.constant 0 : index
      %28 = vector.load %arg7[%c0_29, %c0_30, %c0_31] : memref<1x1x128xf32, #tpu.memory_space<vmem>>, vector<1x1x128xf32>
      tpu.vector_store %arg7[%c0_29, %c0_30, %c0_31], %27 {strides = array<i32>} : memref<1x1x128xf32, #tpu.memory_space<vmem>>, vector<1x1x128xf32>,
    } else {
    }
    %c0 = arith.constant 0 : index
    %c0_2 = arith.constant 0 : index
    %c0_3 = arith.constant 0 : index
    %5 = vector.load %arg3[%c0, %c0_2, %c0_3] : memref<1x4x128xf32, #tpu.memory_space<vmem>>, vector<1x4x128xf32>
    %c0_4 = arith.constant 0 : index
    %c0_5 = arith.constant 0 : index
    %c0_6 = arith.constant 0 : index
    %6 = vector.load %arg4[%c0_4, %c0_5, %c0_6] : memref<1x4x128xf32, #tpu.memory_space<vmem>>, vector<1x4x128xf32>
    %c0_7 = arith.constant 0 : index
    %c0_8 = arith.constant 0 : index
    %c0_9 = arith.constant 0 : index
    %7 = vector.load %arg5[%c0_7, %c0_8, %c0_9] : memref<1x1x128xi8, #tpu.memory_space<vmem>>, vector<1x1x128xi8>
    %8 = arith.sitofp %7 : vector<1x1x128xi8> to vector<1x1x128xf32>
    %cst = arith.constant 1.000000e+00 : f32
    %9 = vector.broadcast %cst : f32 to vector<1x1x128xf32>
    %10 = arith.subf %9, %8 : vector<1x1x128xf32>
    %11 = arith.subf %5, %6 : vector<1x4x128xf32>
    %12 = arith.mulf %11, %11 : vector<1x4x128xf32>
    %13 = vector.broadcast %10 : vector<1x1x128xf32> to vector<1x4x128xf32>
    %14 = arith.mulf %12, %13 : vector<1x4x128xf32>
    %c0_10 = arith.constant 0 : index
    %c0_11 = arith.constant 0 : index
    %c0_12 = arith.constant 0 : index
    %15 = vector.load %arg6[%c0_10, %c0_11, %c0_12] : memref<1x4x128xf32, #tpu.memory_space<vmem>>, vector<1x4x128xf32>
    %cst_13 = arith.constant dense<0.000000e+00> : vector<4x128xf32>
    %16 = vector.multi_reduction <add>, %14, %cst_13 [0] : vector<1x4x128xf32> to vector<4x128xf32>
    %17 = vector.shape_cast %16 : vector<4x128xf32> to vector<1x4x128xf32>
    %18 = arith.addf %15, %17 : vector<1x4x128xf32>
    %c0_14 = arith.constant 0 : index
    %c0_15 = arith.constant 0 : index
    %c0_16 = arith.constant 0 : index
    %19 = vector.load %arg6[%c0_14, %c0_15, %c0_16] : memref<1x4x128xf32, #tpu.memory_space<vmem>>, vector<1x4x128xf32>
    tpu.vector_store %arg6[%c0_14, %c0_15, %c0_16], %18 {strides = array<i32>} : memref<1x4x128xf32, #tpu.memory_space<vmem>>, vector<1x4x128xf32>,
    %c0_17 = arith.constant 0 : index
    %c0_18 = arith.constant 0 : index
    %c0_19 = arith.constant 0 : index
    %20 = vector.load %arg7[%c0_17, %c0_18, %c0_19] : memref<1x1x128xf32, #tpu.memory_space<vmem>>, vector<1x1x128xf32>
    %cst_20 = arith.constant dense<0.000000e+00> : vector<1x128xf32>
    %21 = vector.multi_reduction <add>, %10, %cst_20 [0] : vector<1x1x128xf32> to vector<1x128xf32>
    %22 = vector.shape_cast %21 : vector<1x128xf32> to vector<1x1x128xf32>
    %23 = arith.addf %20, %22 : vector<1x1x128xf32>
    %c0_21 = arith.constant 0 : index
    %c0_22 = arith.constant 0 : index
    %c0_23 = arith.constant 0 : index
    %24 = vector.load %arg7[%c0_21, %c0_22, %c0_23] : memref<1x1x128xf32, #tpu.memory_space<vmem>>, vector<1x1x128xf32>
    tpu.vector_store %arg7[%c0_21, %c0_22, %c0_23], %23 {strides = array<i32>} : memref<1x1x128xf32, #tpu.memory_space<vmem>>, vector<1x1x128xf32>,
    return
  }
  func.func @transform_0(%arg0: i32, %arg1: i32, %arg2: i32) -> (i32, i32, i32) {
    %c1_i32 = arith.constant 1 : i32
    %0 = arith.muli %arg0, %c1_i32 : i32
    %1 = arith.addi %0, %arg1 : i32
    %c0_i32 = arith.constant 0 : i32
    %c0_i32_0 = arith.constant 0 : i32
    return %1, %c0_i32, %arg2 : i32, i32, i32
  }
  func.func @transform_1(%arg0: i32, %arg1: i32, %arg2: i32) -> (i32, i32, i32) {
    %c1_i32 = arith.constant 1 : i32
    %0 = arith.muli %arg0, %c1_i32 : i32
    %1 = arith.addi %0, %arg1 : i32
    %c0_i32 = arith.constant 0 : i32
    %c0_i32_0 = arith.constant 0 : i32
    return %1, %c0_i32, %arg2 : i32, i32, i32
  }
  func.func @transform_2(%arg0: i32, %arg1: i32, %arg2: i32) -> (i32, i32, i32) {
    %c1_i32 = arith.constant 1 : i32
    %0 = arith.muli %arg0, %c1_i32 : i32
    %1 = arith.addi %0, %arg1 : i32
    %c0_i32 = arith.constant 0 : i32
    %c0_i32_0 = arith.constant 0 : i32
    return %1, %c0_i32, %arg2 : i32, i32, i32
  }
  func.func @transform_3(%arg0: i32, %arg1: i32, %arg2: i32) -> (i32, i32, i32) {
    %c0_i32 = arith.constant 0 : i32
    %c0_i32_0 = arith.constant 0 : i32
    %c0_i32_1 = arith.constant 0 : i32
    return %arg0, %c0_i32, %c0_i32_0 : i32, i32, i32
  }
  func.func @transform_4(%arg0: i32, %arg1: i32, %arg2: i32) -> (i32, i32, i32) {
    %c0_i32 = arith.constant 0 : i32
    %c0_i32_0 = arith.constant 0 : i32
    %c0_i32_1 = arith.constant 0 : i32
    return %arg0, %c0_i32, %c0_i32_0 : i32, i32, i32
  }
}

</mosaic_0001>

<bundles_post_ra>
// kernel: tpu_custom_call.1
= control target key start
LH: loop header
LB: loop body
LE: loop exit
PB: predicated region body
PF: predicated region fallthrough
CT: control target
= control target key end

     0   :  { %10 = vsyncpa [#allocation3], 0  ;;  %s986_s0 = inlined_call_operand.hbm [shape: f32[2,4,128], index: 0, kind: input, shape index: {}]   ;;  %s987_s1 = inlined_call_operand.hbm [shape: f32[2,4,128], index: 1, kind: input, shape index: {}]   ;;  %s988_s2 = inlined_call_operand.vmem [shape: s8[2,1,128], index: 2, kind: input, shape index: {}]   ;;  %s989_s3 = inlined_call_operand.hbm [shape: f32[2,4,128], index: 3, kind: output, shape index: {0}]   ;;  %s990_s4 = inlined_call_operand.hbm [shape: f32[2,1,128], index: 4, kind: output, shape index: {1}]  }
   0x1   :  { %12 = vsyncpa [#allocation3 + $0x1], 0 }
   0x2   :  { %13 = vsyncpa [#allocation6], 0 }
   0x3   :  { %15 = vsyncpa [#allocation6 + $0x1], 0 }
   0x4   :  { %16 = vsyncpa [#allocation4], 0 }
   0x5   :  { %18 = vsyncpa [#allocation4 + $0x1], 0 }
   0x6   :  { %19 = vsyncpa [#allocation9], 0 }
   0x7   :  { %21 = vsyncpa [#allocation9 + $0x1], 0  ;;  %s831_s15 = smov 0   ;;  %s833_s16 = smov 0  }
   0x8   :  { %s835_s17 = smov 0   ;;  %s837_s18 = smov 0  }
   0x9   :  { %s839_s19 = smov 0   ;;  %s841_s20 = smov 0  }
   0xa LB: > { %s536_s21 = sadd.s32 4294967295, %s803_s20   ;;  %s537_s22 = sadd.s32 4294967294, %s803_s20   ;;  %s803_s20 = sphi %s841_s20, %s27_s20   ;;  %s799_s19 = sphi %s839_s19, %s1002_s19   ;;  %s795_s18 = sphi %s837_s18, %s1001_s18   ;;  %s791_s17 = sphi %s835_s17, %s1000_s17   ;;  %s787_s16 = sphi %s833_s16, %s999_s16   ;;  %s783_s15 = sphi %s831_s15, %s998_s15  }
   0xb   : > { %s46_s23 = sadd.s32 1, %s799_s19  ;;  %s57_s24 = sadd.s32 1, %s791_s17 }
   0xc   : > { %p48_p0 = scmp.ge.s32.totalorder %s46_s23, 2  ;;  %p64_p1 = scmp.ne.s32.totalorder %s791_s17, %s787_s16 }
   0xd   : > { %p65_p2 = scmp.eq.s32.totalorder %s803_s20, 0  ;;  %p70_p3 = scmp.ne.s32.totalorder %s787_s16, %s783_s15 }
   0xe   : > { %s1004_s23 = smov (%p48_p0, %s46_s23), 0  ;;  %p71_p5 = scmp.eq.s32.totalorder %s536_s21, 0 }
   0xf   : > { %992 = sst [smem:[#allocation14_spill]] %s1004_s23  ;;  %p872_p4 = por %p65_p2, %p64_p1 }
  0x10   : > { %s52_s26 = ssub.s32 %s799_s19, %s1004_s23  ;;  %p154_p6 = scmp.eq.s32.totalorder %s536_s21, 1 }
  0x11   : > { %p55_p7 = scmp.eq.s32.totalorder %s52_s26, 0  ;;  %p878_p8 = por %p71_p5, %p70_p3 }
  0x12   : > { %p882_p9 = por %p154_p6, %p64_p1  ;;  %p160_p10 = scmp.eq.s32.totalorder %s537_s22, 1 }
  0x13   : > { %s887_s29 = scalar_select %p55_p7, %s791_s17, %s57_s24  }
  0x14   : > { %p889_p11 = por %p160_p10, %p70_p3  ;;  %p539_p12 = scmp.ge.s32.totalorder %s803_s20, 2 }
  0x15   : > { %p574_p13 = scmp.lt.s32.totalorder %s803_s20, 2  ;;  %s206_s5 = sand.u32 1, %s791_s17  }
  0x16   : > { %s540_s6 = sshll.u32 %s206_s5, 2  ;;  %s541_s7 = sshll.u32 %s799_s19, 2 }
  0x17   : > { %s216_s10 = scalar_lea.hbm %s986_s0, %s541_s7  ;;  %s210_s11 = scalar_lea.vmem [#allocation2], %s540_s6 }
  0x18   : > { %s220_s12 = sshll.u32 %s210_s11, 4  ;;  %s218_s13 = sshll.u32 %s216_s10, 4  ;;  %s221_s12 = int_to_ptr.vmem [resolvable:$true] %s220_s12  ;;  %s219_s13 = int_to_ptr.hbm [resolvable:$true] %s218_s13 }
  0x19   : > { %p561_p0 = pnand %p574_p13, %p872_p4  ;;  %p544_p1 = scmp.ge.s32.totalorder %s803_s20, 1 }
  0x1a   : > { %p257_p2 = scmp.lt.s32.totalorder %s803_s20, 3  ;;  %s207_s14 = scalar_lea.sflag [#allocation3], %s206_s5 }
  0x1b   : > { %563 = dma.hbm_to_vmem [thread:$0]  (!%p561_p0), %s219_s13, 64, %s221_s12, %s207_s14  }
  0x1c   : > { %p258_p3 = pnand %p544_p1, %p257_p2  ;;  %s237_s24 = scalar_lea.hbm %s987_s1, %s541_s7 }
  0x1d   : > { %s231_s26 = scalar_lea.vmem [#allocation5], %s540_s6  ;;  %s239_s8 = sshll.u32 %s237_s24, 4  ;;  %s240_s8 = int_to_ptr.hbm [resolvable:$true] %s239_s8 }
  0x1e   : > { %s241_s23 = sshll.u32 %s231_s26, 4  ;;  %s228_s9 = scalar_lea.sflag [#allocation6], %s206_s5  ;;  %s242_s23 = int_to_ptr.vmem [resolvable:$true] %s241_s23 }
  0x1f   : > { %566 = dma.hbm_to_vmem [thread:$0]  (!%p561_p0), %s240_s8, 64, %s242_s23, %s228_s9  }
  0x20   : > { %261 = sbr.rel (%p258_p3) target bundleno = 71 (0x47), region = 32  ;;  %s908_s25 = sand.u32 (!%p258_p3), 1, %s787_s16  }
  0x21   : > { %s545_s10 = sshll.u32 (!%p258_p3), %s908_s25, 2  ;;  %s264_s11 = scalar_lea.sflag (!%p258_p3), [#allocation3], %s908_s25 }
  0x22   : > { %s267_s12 = scalar_lea.vmem (!%p258_p3), [#allocation2], %s545_s10 }
  0x25   : > { %766 = dma.done.wait (%p878_p8), %s264_s11, 64  }
  0x26   : > { %768 = vsyncadd (%p878_p8), %s264_s11, 4294967232  ;;  %s274_s6 = scalar_lea.sflag [#allocation6], %s908_s25  ;;  %s277_s5 = scalar_lea.vmem [#allocation5], %s545_s10 }
  0x27   : > { %770 = dma.done.wait (%p878_p8), %s274_s6, 64  }
  0x28   : > { %772 = vsyncadd (%p878_p8), %s274_s6, 4294967232  ;;  %s921_s23 = scalar_lea.vmem [#allocation7], %s545_s10  ;;  %v805_v0 = vmov 0.0   ;;  %p322_p4 = scmp.lt.s32.totalorder %s795_s18, 1  ;;  %v337_v1 = vld [vmem:[%s267_s12] sm:$0xf] }
  0x29   : > { %335 = vst [vmem:[%s921_s23] sm:$0xf] %v805_v0  ;;  %s318_s7 = scalar_lea.vmem [#allocation8], %s908_s25  ;;  %v338_v2 = vld [vmem:[%s277_s5] sm:$0xf]  ;;  %s383_s26 = scalar_lea.hbm %s990_s4, %s795_s18 }
  0x2a   : > { %336 = vst [vmem:[%s318_s7] sm:$0x1] %v805_v0  ;;  %s323_s13 = scalar_select %p322_p4, %s795_s18, 1  ;;  %v343_v5 = vsub.f32 %v337_v1, %v338_v2 }
  0x2b   : > { %s549_s8 = sshll.u32 %s795_s18, 2  ;;  %s385_s9 = sshll.u32 %s318_s7, 4  ;;  %s386_s9 = int_to_ptr.vmem [resolvable:$true] %s385_s9 }
  0x2c   : > { %s327_s22 = scalar_lea.vmem %s988_s2, %s323_s13  ;;  %s387_s10 = sshll.u32 %s383_s26, 4  ;;  %v344_v9 = vmul.f32 %v343_v5, %v343_v5  ;;  %s388_s10 = int_to_ptr.hbm [resolvable:$true] %s387_s10 }
  0x2d   : > { %v339_v3 = vld [vmem:[%s327_s22] sm:$0x1]  ;;  %s370_s6 = scalar_lea.hbm %s989_s3, %s549_s8  ;;  %s372_s5 = sshll.u32 %s921_s23, 4  ;;  %s373_s5 = int_to_ptr.vmem [resolvable:$true] %s372_s5 }
  0x2e   : > { %v340_v4 = vunpack.c.0.s8 %v339_v3  ;;  %s374_s13 = sshll.u32 %s370_s6, 4  ;;  %s361_s18 = scalar_lea.sflag [#allocation9], %s908_s25  ;;  %s375_s13 = int_to_ptr.hbm [resolvable:$true] %s374_s13 }
  0x2f   : > { %s699_s14 = sshra.s32 %s388_s10, 4  ;;  %s705_s24 = scalar_lea.hbm %s990_s4, 2  ;;  %s700_s14 = int_to_ptr.hbm [resolvable:$true] %s699_s14 }
  0x30   : > { %v341_v6 = vcvt.s32.f32 %v340_v4  ;;  %v347_v12 = vld [vmem:[%s921_s23] sm:$0xf]  ;;  %s701_s21 = scalar_lea.hbm %s700_s14, 1  ;;  %p706_p8 = scmp.lt.s32.totalorder %s700_s14, %s990_s4 }
  0x31   : > { %v351_v7 = vld [vmem:[%s318_s7] sm:$0x1]  ;;  %p702_p5 = scmp.ne.s32.totalorder %s700_s14, %s701_s21  ;;  %p707_p10 = scmp.lt.s32.totalorder %s705_s24, %s701_s21 }
  0x32   : > { %v342_v8 = vsub.f32 1.0, %v341_v6 }
  0x33   : > { %p703_p6 = pnand %p702_p5, %p882_p9  ;;  %p708_p13 = por %p707_p10, %p706_p8 }
  0x34   : > { %v345_v10 = vperm.slane %v342_v8, 0  ;;  %v353_v11 = vadd.f32 %v351_v7, %v342_v8 }
  0x35   : > { %p704_p7 = pneg %p703_p6 }
  0x36   : > { %v346_v13 = vmul.f32 %v345_v10, %v344_v9  ;;  %354 = vst [vmem:[%s318_s7] sm:$0x1] %v353_v11 }
  0x37   : > { %p709_p0 = pnand %p708_p13, %p704_p7 }
  0x39   : > { %712 = shalt.err (!%p709_p0)
}
  0x3a   : > { %557 = dma.vmem_to_hbm [thread:$0]  (%p882_p9), %s386_s9, 16, %s388_s10, %s361_s18   ;;  %v349_v14 = vadd.f32 %v347_v12, %v346_v13 }
  0x3b   : > { %s356_s7 = scalar_lea.sflag [#allocation4], %s908_s25  ;;  %s727_s11 = sshra.s32 %s375_s13, 4  ;;  %s728_s11 = int_to_ptr.hbm [resolvable:$true] %s727_s11 }
  0x3c   : > { %350 = vst [vmem:[%s921_s23] sm:$0xf] %v349_v14  ;;  %s729_s12 = scalar_lea.hbm %s728_s11, 4  ;;  %s733_s21 = scalar_lea.hbm %s989_s3, 8 }
  0x3d   : > { %p730_p1 = scmp.ne.s32.totalorder %s728_s11, %s729_s12  ;;  %p734_p4 = scmp.lt.s32.totalorder %s728_s11, %s989_s3 }
  0x3e   : > { %p735_p5 = scmp.lt.s32.totalorder %s733_s21, %s729_s12 }
  0x3f   : > { %p731_p2 = pnand %p730_p1, %p882_p9 }
  0x40   : > { %p736_p6 = por %p735_p5, %p734_p4 }
  0x41   : > { %p732_p3 = pneg %p731_p2 }
  0x43   : > { %p737_p7 = pnand %p736_p6, %p732_p3 }
  0x45   : > { %740 = shalt.err (!%p737_p7)
}
  0x46   : > { %556 = dma.vmem_to_hbm [thread:$0]  (%p882_p9), %s373_s5, 64, %s375_s13, %s356_s7  }
  0x47 PF: > { %s399_s25 = sand.u32 1, %s783_s15   ;;  %p568_p8 = pnand %p539_p12, %p889_p11 }
  0x48   : > { %s400_s23 = scalar_lea.sflag [#allocation4], %s399_s25 }
  0x49   : > { %p569_p10 = pneg %p568_p8 }
  0x4b   : > { %774 = dma.done.wait (%p569_p10), %s400_s23, 64  }
  0x4c   : > { %776 = vsyncadd (%p569_p10), %s400_s23, 4294967232  ;;  %s410_s9 = scalar_lea.sflag [#allocation9], %s399_s25 }
  0x4d   : > { %778 = dma.done.wait (%p569_p10), %s410_s9, 16  }
  0x4e   : > { %780 = vsyncadd (%p569_p10), %s410_s9, 4294967280  ;;  %s27_s20 = sadd.s32 1, %s803_s20   ;;  %s997_s28 = sld [smem:[#allocation14_spill]] }
  0x4f   : > { %p24_p13 = scmp.ge.s32.totalorder %s27_s20, 4   ;;  %s998_s15 = smov %s787_s16 }
  0x50   : > { %s999_s16 = smov %s791_s17  ;;  %s1000_s17 = smov %s887_s29 }
  0x51   : > { %s1001_s18 = smov %s799_s19  ;;  %26 = sbr.rel (!%p24_p13) target bundleno = 10 (0xa), region = 114 }
  0x54   : > { %s1002_s19 = smov %s997_s28 }
  0x56   :  { %415 = vsyncpa [#allocation3], 1 }
  0x57   :  { %417 = vsyncpa [#allocation3 + $0x1], 1 }
  0x58   :  { %418 = vsyncpa [#allocation6], 1 }
  0x59   :  { %420 = vsyncpa [#allocation6 + $0x1], 1 }
  0x5a   :  { %421 = vsyncpa [#allocation4], 1 }
  0x5b   :  { %423 = vsyncpa [#allocation4 + $0x1], 1 }
  0x5c   :  { %424 = vsyncpa [#allocation9], 1 }
  0x5d   :  { %426 = vsyncpa [#allocation9 + $0x1], 1 }

</bundles_post_ra>
